<compile_context>
chip_gen: v7x
topology: tpu7x:2x2x1
jax: 0.10.0
libtpu: 0.0.40
codegen_flags: <defaults>
</compile_context>

<pallas_src>
import jax
import jax.numpy as jnp
from jax.experimental import pallas as pl
from jax.experimental.pallas import tpu as pltpu

HIDDEN = 600            # Hiden_Number / feature_size
HIDDEN_PAD = 640        # padded to a multiple of 128 lanes
NUM_FTRS = 2048         # 2048 * 1 * 1
N_ORDER = 13
N_FAMILY = 38
N_SPECIES = 200
HEADS = N_ORDER + N_FAMILY + N_SPECIES   # 251
HEADS_PAD = 256                          # padded to a multiple of 128 lanes
SPATIAL = 49            # 7 x 7 feature map
SPATIAL_PAD = 56        # padded to a multiple of 8 sublanes
BN_EPS = 1e-5
NEG = -1e30             # "minus infinity" that never produces inf-inf NaNs

SEGMENTS = (
    (0, N_ORDER),
    (N_ORDER, N_ORDER + N_FAMILY),
    (N_ORDER + N_FAMILY, HEADS),
)


# --------------------------------------------------------------------------
# Kernel 1: MaxPool2d(7,7) over the 7x7 map, batch-tiled & pipelined.
# --------------------------------------------------------------------------
def maxpool_kernel(x_ref, o_ref):
    # x_ref: (TB, 56, 2048); spatial rows 49:56 are padded with NEG.
    x = x_ref[...]
    m = x[:, 0:8, :]
    for i in range(1, SPATIAL_PAD // 8):          # unrolled VPU maximum tree
        m = jnp.maximum(m, x[:, i * 8:(i + 1) * 8, :])
    o_ref[...] = jnp.max(m, axis=1)               # (TB, 2048)


# --------------------------------------------------------------------------
# Kernel 2: BN -> Linear(bf16) -> BN -> ELU -> fused heads -> softmax + NLL
# --------------------------------------------------------------------------
def _batchnorm_train(x, gamma, beta):
    # BatchNorm1d, training mode: per-feature batch mean / biased variance.
    mu = jnp.mean(x, axis=0, keepdims=True)
    var = jnp.mean((x - mu) ** 2, axis=0, keepdims=True)
    return (x - mu) * jax.lax.rsqrt(var + BN_EPS) * gamma + beta


def main_kernel(p_ref, g1_ref, be1_ref, w1_ref, b1_ref, g2_ref, be2_ref,
                wh_ref, bh_ref, oh_ref, loss_ref, probs_ref):
    pooled = p_ref[...]                                       # (B, 2048) f32

    # ---- features_1: BN1d(2048) -> Linear(2048, 640pad) -> BN1d -> ELU ----
    xn = _batchnorm_train(pooled, g1_ref[...], be1_ref[...])
    lin = jnp.dot(xn.astype(jnp.bfloat16), w1_ref[...],
                  preferred_element_type=jnp.float32) + b1_ref[...]
    h = _batchnorm_train(lin, g2_ref[...], be2_ref[...])
    h = jnp.where(h > 0, h, jnp.exp(jnp.minimum(h, 0.0)) - 1.0)   # ELU(alpha=1)

    # ---- fused classifier heads: one lane-dense (B,640)x(640,256) matmul ----
    # (detach in the original only affects gradients; forward values identical.)
    z = jnp.dot(h.astype(jnp.bfloat16), wh_ref[...],
                preferred_element_type=jnp.float32) + bh_ref[...]  # (B, 256)

    lane = jax.lax.broadcasted_iota(jnp.int32, (1, HEADS_PAD), 1)
    log_p = jnp.zeros_like(z)
    probs = jnp.zeros_like(z)
    for lo, hi in SEGMENTS:            # per-head masked softmax via logsumexp
        mask = jnp.logical_and(lane >= lo, lane < hi)
        zm = jnp.where(mask, z, NEG)
        seg_max = jnp.max(zm, axis=1, keepdims=True)
        e = jnp.exp(zm - seg_max)                 # masked lanes -> exp(-big)=0
        seg_sum = jnp.sum(e, axis=1, keepdims=True)
        seg_lse = seg_max + jnp.log(seg_sum)
        log_p = jnp.where(mask, z - seg_lse, log_p)
        probs = jnp.where(mask, e * pl.reciprocal(seg_sum, approx=False), probs)

    probs_ref[...] = probs                        # (B, 256) lane-dense slab

    # NLLLoss(log(softmax), target), reduction='mean', summed over the 3 heads.
    inv_b = 1.0 / p_ref.shape[0]
    loss_ref[0] = -jnp.sum(oh_ref[...] * log_p) * inv_b


# --------------------------------------------------------------------------
# Wrapper
# --------------------------------------------------------------------------
def model_bn_forward(x_feat, packed, oh_order, oh_family, oh_species):
    """x_feat: (B, 49, 2048) backbone feature map (NCHW (B,2048,7,7) re-laid)."""
    B = x_feat.shape[0]

    # -------- stage 1: MaxPool2d(7,7), batch-tiled grid --------
    tb = min(8, B)
    b_pad = ((B + tb - 1) // tb) * tb
    x_pad = jnp.pad(x_feat,
                    ((0, b_pad - B), (0, SPATIAL_PAD - SPATIAL), (0, 0)),
                    constant_values=NEG)
    pooled = pl.pallas_call(
        maxpool_kernel,
        out_shape=jax.ShapeDtypeStruct((b_pad, NUM_FTRS), jnp.float32),
        grid=(b_pad // tb,),
        in_specs=[pl.BlockSpec((tb, SPATIAL_PAD, NUM_FTRS), lambda i: (i, 0, 0))],
        out_specs=pl.BlockSpec((tb, NUM_FTRS), lambda i: (i, 0)),
        compiler_params=pltpu.CompilerParams(
            dimension_semantics=("parallel",), vmem_limit_bytes=32 << 20),
    )(x_pad)[:B]

    # -------- stage 2: BN / Linear / BN / ELU / fused heads / loss --------
    oh_all = jnp.concatenate(
        [oh_order, oh_family, oh_species,
         jnp.zeros((B, HEADS_PAD - HEADS), jnp.float32)], axis=1)   # (B, 256)

    vmem = pl.BlockSpec(memory_space=pltpu.MemorySpace.VMEM)
    smem = pl.BlockSpec(memory_space=pltpu.MemorySpace.SMEM)
    loss, probs = pl.pallas_call(
        main_kernel,
        out_shape=(jax.ShapeDtypeStruct((1,), jnp.float32),          # ce_loss
                   jax.ShapeDtypeStruct((B, HEADS_PAD), jnp.float32)),  # probs
        in_specs=[vmem] * 10,
        out_specs=(smem, vmem),
        compiler_params=pltpu.CompilerParams(vmem_limit_bytes=32 << 20),
    )(pooled,
      packed["g1"], packed["be1"], packed["w1"], packed["b1"],
      packed["g2"], packed["be2"], packed["wh"], packed["bh"], oh_all)

    order_out = probs[:, 0:N_ORDER]
    family_out = probs[:, N_ORDER:N_ORDER + N_FAMILY]
    species_out = probs[:, N_ORDER + N_FAMILY:HEADS]
    return loss[0], species_out, family_out, order_out


# --------------------------------------------------------------------------
# Parameters (PyTorch-like), then packed/padded/fused for the kernel.
# --------------------------------------------------------------------------
def init_params(key):
    ks = jax.random.split(key, 4)

    def lin(k, fan_in, fan_out):
        bound = 1.0 / jnp.sqrt(jnp.float32(fan_in))
        kw, kb = jax.random.split(k)
        w = jax.random.uniform(kw, (fan_in, fan_out), jnp.float32, -bound, bound)
        b = jax.random.uniform(kb, (1, fan_out), jnp.float32, -bound, bound)
        return w, b

    w1, b1 = lin(ks[0], NUM_FTRS, HIDDEN)
    wo, bo = lin(ks[1], HIDDEN, N_ORDER)
    wf, bf = lin(ks[2], HIDDEN // 3 * 2, N_FAMILY)
    ws, bs = lin(ks[3], HIDDEN // 3, N_SPECIES)
    return {
        "g1": jnp.ones((1, NUM_FTRS), jnp.float32),
        "be1": jnp.zeros((1, NUM_FTRS), jnp.float32),
        "w1": w1, "b1": b1,
        "g2": jnp.ones((1, HIDDEN), jnp.float32),
        "be2": jnp.zeros((1, HIDDEN), jnp.float32),
        "wo": wo, "bo": bo, "wf": wf, "bf": bf, "ws": ws, "bs": bs,
    }


def pack_params(p):
    """Pad HIDDEN 600->640, fuse the 3 heads into one (640,256) zero-padded
    weight, and cast the two matmul weights to bf16 (f32 accumulation)."""
    w1 = jnp.zeros((NUM_FTRS, HIDDEN_PAD), jnp.float32).at[:, :HIDDEN].set(p["w1"])
    b1 = jnp.zeros((1, HIDDEN_PAD), jnp.float32).at[:, :HIDDEN].set(p["b1"])
    g2 = jnp.ones((1, HIDDEN_PAD), jnp.float32).at[:, :HIDDEN].set(p["g2"])
    be2 = jnp.zeros((1, HIDDEN_PAD), jnp.float32).at[:, :HIDDEN].set(p["be2"])

    wh = jnp.zeros((HIDDEN_PAD, HEADS_PAD), jnp.float32)
    # order head sees all of h[:, 0:600]  (cat(x1, x2.detach, x3.detach))
    wh = wh.at[0:HIDDEN, 0:N_ORDER].set(p["wo"])
    # family head sees h[:, 200:600]      (cat(x2, x3.detach))
    wh = wh.at[HIDDEN // 3:HIDDEN, N_ORDER:N_ORDER + N_FAMILY].set(p["wf"])
    # species head sees h[:, 400:600]     (x3)
    wh = wh.at[HIDDEN // 3 * 2:HIDDEN, N_ORDER + N_FAMILY:HEADS].set(p["ws"])

    bh = jnp.zeros((1, HEADS_PAD), jnp.float32)
    bh = bh.at[:, 0:N_ORDER].set(p["bo"])
    bh = bh.at[:, N_ORDER:N_ORDER + N_FAMILY].set(p["bf"])
    bh = bh.at[:, N_ORDER + N_FAMILY:HEADS].set(p["bs"])

    return {
        "g1": p["g1"], "be1": p["be1"],
        "w1": w1.astype(jnp.bfloat16), "b1": b1,
        "g2": g2, "be2": be2,
        "wh": wh.astype(jnp.bfloat16), "bh": bh,
    }


def reference_forward(x_feat, p, oh_order, oh_family, oh_species):
    """Pure-JAX f32 reference of the same forward (for a sanity check)."""
    pooled = jnp.max(x_feat, axis=1)

    def bn(x, g, b):
        mu = jnp.mean(x, axis=0, keepdims=True)
        var = jnp.mean((x - mu) ** 2, axis=0, keepdims=True)
        return (x - mu) / jnp.sqrt(var + BN_EPS) * g + b

    xn = bn(pooled, p["g1"], p["be1"])
    h = bn(xn @ p["w1"] + p["b1"], p["g2"], p["be2"])
    h = jnp.where(h > 0, h, jnp.exp(jnp.minimum(h, 0.0)) - 1.0)
    order = jax.nn.softmax(h @ p["wo"] + p["bo"], axis=1)
    family = jax.nn.softmax(h[:, HIDDEN // 3:] @ p["wf"] + p["bf"], axis=1)
    species = jax.nn.softmax(h[:, HIDDEN // 3 * 2:] @ p["ws"] + p["bs"], axis=1)

    def nll(pr, oh):
        return -jnp.mean(jnp.sum(oh * jnp.log(pr), axis=1))

    loss = (nll(order, oh_order) + nll(family, oh_family)
            + nll(species, oh_species))
    return loss, species, family, order


if __name__ == "__main__":
    key = jax.random.PRNGKey(0)
    k_x, k_t, k_p = jax.random.split(key, 3)

    B = 2
    # Backbone output feature map: PyTorch NCHW (B, 2048, 7, 7) -> (B, 49, 2048)
    x_nchw = jax.random.normal(k_x, (B, NUM_FTRS, 7, 7), jnp.float32)
    x_feat = jnp.transpose(x_nchw.reshape(B, NUM_FTRS, SPATIAL), (0, 2, 1))

    targets = jax.random.randint(k_t, (B,), 0, N_SPECIES)
    # Synthetic deterministic species -> (order, family) maps (see TODO above).
    order_map = jnp.arange(N_SPECIES) % N_ORDER
    family_map = jnp.arange(N_SPECIES) % N_FAMILY
    oh_order = jax.nn.one_hot(order_map[targets], N_ORDER, dtype=jnp.float32)
    oh_family = jax.nn.one_hot(family_map[targets], N_FAMILY, dtype=jnp.float32)
    oh_species = jax.nn.one_hot(targets, N_SPECIES, dtype=jnp.float32)

    params = init_params(k_p)
    packed = pack_params(params)

    ce_loss, species_out, family_out, order_out = jax.block_until_ready(
        model_bn_forward(x_feat, packed, oh_order, oh_family, oh_species))

    assert species_out.shape == (B, N_SPECIES)
    assert family_out.shape == (B, N_FAMILY)
    assert order_out.shape == (B, N_ORDER)
    assert bool(jnp.isfinite(ce_loss))
    # softmax rows must sum to 1
    assert bool(jnp.allclose(jnp.sum(species_out, axis=1), 1.0, atol=1e-4))
    assert bool(jnp.allclose(jnp.sum(family_out, axis=1), 1.0, atol=1e-4))
    assert bool(jnp.allclose(jnp.sum(order_out, axis=1), 1.0, atol=1e-4))

    # cross-check against a pure-JAX f32 reference (bf16 matmul operands in
    # the kernel -> loose tolerance)
    ref_loss, ref_sp, ref_fam, ref_ord = reference_forward(
        x_feat, params, oh_order, oh_family, oh_species)
    assert bool(jnp.max(jnp.abs(species_out - ref_sp)) < 3e-2)
    assert bool(jnp.max(jnp.abs(family_out - ref_fam)) < 3e-2)
    assert bool(jnp.max(jnp.abs(order_out - ref_ord)) < 3e-2)
    assert bool(jnp.abs(ce_loss - ref_loss) < 1e-1)

    print("KERNEL_OK")
</pallas_src>

<mosaic_0001>
module attributes {stable_mosaic.version = 11 : i64} {
  func.func @maxpool_kernel(%arg0: i32, %arg1: memref<2x56x2048xf32, #tpu.memory_space<vmem>>, %arg2: memref<2x2048xf32, #tpu.memory_space<vmem>>) attributes {dimension_semantics = [#tpu.dimension_semantics<parallel>], iteration_bounds = array<i64: 1>, scalar_prefetch = 0 : i64, scratch_operands = 0 : i64, tpu.core_type = #tpu.core_type<tc>, window_params = [{transform_indices = @transform_0, window_bounds = array<i64: 2, 56, 2048>}, {transform_indices = @transform_1, window_bounds = array<i64: 2, 2048>}]} {
    %c0 = arith.constant 0 : index
    %c0_0 = arith.constant 0 : index
    %c0_1 = arith.constant 0 : index
    %0 = vector.load %arg1[%c0, %c0_0, %c0_1] : memref<2x56x2048xf32, #tpu.memory_space<vmem>>, vector<2x56x2048xf32>
    %1 = vector.extract_strided_slice %0 {offsets = [0, 0, 0], sizes = [2, 8, 2048], strides = [1, 1, 1]} : vector<2x56x2048xf32> to vector<2x8x2048xf32>
    %2 = vector.extract_strided_slice %0 {offsets = [0, 8, 0], sizes = [2, 8, 2048], strides = [1, 1, 1]} : vector<2x56x2048xf32> to vector<2x8x2048xf32>
    %3 = arith.maximumf %1, %2 : vector<2x8x2048xf32>
    %4 = vector.extract_strided_slice %0 {offsets = [0, 16, 0], sizes = [2, 8, 2048], strides = [1, 1, 1]} : vector<2x56x2048xf32> to vector<2x8x2048xf32>
    %5 = arith.maximumf %3, %4 : vector<2x8x2048xf32>
    %6 = vector.extract_strided_slice %0 {offsets = [0, 24, 0], sizes = [2, 8, 2048], strides = [1, 1, 1]} : vector<2x56x2048xf32> to vector<2x8x2048xf32>
    %7 = arith.maximumf %5, %6 : vector<2x8x2048xf32>
    %8 = vector.extract_strided_slice %0 {offsets = [0, 32, 0], sizes = [2, 8, 2048], strides = [1, 1, 1]} : vector<2x56x2048xf32> to vector<2x8x2048xf32>
    %9 = arith.maximumf %7, %8 : vector<2x8x2048xf32>
    %10 = vector.extract_strided_slice %0 {offsets = [0, 40, 0], sizes = [2, 8, 2048], strides = [1, 1, 1]} : vector<2x56x2048xf32> to vector<2x8x2048xf32>
    %11 = arith.maximumf %9, %10 : vector<2x8x2048xf32>
    %12 = vector.extract_strided_slice %0 {offsets = [0, 48, 0], sizes = [2, 8, 2048], strides = [1, 1, 1]} : vector<2x56x2048xf32> to vector<2x8x2048xf32>
    %13 = arith.maximumf %11, %12 : vector<2x8x2048xf32>
    %cst = arith.constant dense<0xFF800000> : vector<2x2048xf32>
    %14 = vector.multi_reduction <maximumf>, %13, %cst [1] : vector<2x8x2048xf32> to vector<2x2048xf32>
    %c0_2 = arith.constant 0 : index
    %c0_3 = arith.constant 0 : index
    %15 = vector.load %arg2[%c0_2, %c0_3] : memref<2x2048xf32, #tpu.memory_space<vmem>>, vector<2x2048xf32>
    tpu.vector_store %arg2[%c0_2, %c0_3], %14 {strides = array<i32>} : memref<2x2048xf32, #tpu.memory_space<vmem>>, vector<2x2048xf32>,
    return
  }
  func.func @transform_0(%arg0: i32) -> (i32, i32, i32) {
    %c0_i32 = arith.constant 0 : i32
    %c0_i32_0 = arith.constant 0 : i32
    %c0_i32_1 = arith.constant 0 : i32
    return %arg0, %c0_i32, %c0_i32_0 : i32, i32, i32
  }
  func.func @transform_1(%arg0: i32) -> (i32, i32) {
    %c0_i32 = arith.constant 0 : i32
    %c0_i32_0 = arith.constant 0 : i32
    return %arg0, %c0_i32 : i32, i32
  }
}

</mosaic_0001>

<bundles_post_ra>
// kernel: tpu_custom_call.1
= control target key start
LH: loop header
LB: loop body
LE: loop exit
PB: predicated region body
PF: predicated region fallthrough
CT: control target
= control target key end

     0   :  { %6 = vsyncpa [#allocation3], 0  ;;  %s1474_s0 = inlined_call_operand.hbm [shape: f32[2,56,2048], index: 0, kind: input, shape index: {}]   ;;  %s1475_s1 = inlined_call_operand.hbm [shape: f32[2,2048], index: 1, kind: output, shape index: {}]  }
   0x1   :  { %7 = vsyncpa [#allocation4], 0  ;;  %s909_s6 = smov [#allocation2]   ;;  %s861_s10 = scalar_lea.hbm %s1474_s0, 28672 }
   0x2   :  { %s13_s7 = sshll.u32 %s909_s6, 4  ;;  %p862_p0 = scmp.ne.s32.totalorder %s1474_s0, %s861_s10  ;;  %s14_s7 = int_to_ptr.vmem [resolvable:$true] %s13_s7 }
   0x3   :  { %p865_p1 = scmp.lt.u32.totalorder %s861_s10, %s1474_s0 }
   0x5   :  { %p867_p2 = pnand %p865_p1, %p862_p0 }
   0x7   :  { %870 = shalt.err (!%p867_p2)
}
   0x8   :  { %s871_s15 = scalar_lea.vmem %s14_s7, 28672  ;;  %p876_p4 = scmp.lt.s32.totalorder %s14_s7, %s14_s7 }
   0x9   :  { %p872_p3 = scmp.ne.s32.totalorder %s14_s7, %s871_s15  ;;  %p877_p5 = scmp.lt.s32.totalorder %s871_s15, %s871_s15 }
   0xb   :  { %p878_p6 = por %p877_p5, %p876_p4 }
   0xd   :  { %p879_p7 = pnand %p878_p6, %p872_p3 }
   0xf   :  { %882 = shalt.err (!%p879_p7)
}
  0x10   :  { %s910_s16 = smov 2048   ;;  %s911_s17 = smov 128  }
  0x11   :  { %19 = dma.hbm_to_vmem [thread:$0]  %s1474_s0, 28672, %s14_s7, [#allocation3], %s910_s16, %s910_s16, %s911_s17  }
  0x12   :  { %905 = dma.done.wait [#allocation3], 28672  }
  0x13   :  { %906 = vsyncadd [#allocation3], 4294938624  ;;  %v912_v0 = vmov 1983009808   ;;  %v668_v2 = vlaneseq  ;;  %v936_v3 = vld [vmem:[#allocation2] sm:$0xff]  ;;  %v938_v4 = vld [vmem:[#allocation2 + $0x8] sm:$0xff] }
  0x14   :  { %v666_v1 = vunpack.c.l.s4 %v912_v0  ;;  %v940_v5 = vld [vmem:[#allocation2 + $0x10] sm:$0xff]  ;;  %v942_v6 = vld [vmem:[#allocation2 + $0x18] sm:$0xff]  ;;  %v39_v7 = vld [vmem:[#allocation2 + $0x80] sm:$0xff]  ;;  %vm804_vm0 = vcmask 1041409   ;;  %vm806_vm1 = vcmask 1043459   ;;  %vm808_vm2 = vcmask 1045509  }
  0x15   :  { %v40_v8 = vld [vmem:[#allocation2 + $0x88] sm:$0xff]  ;;  %v944_v9 = vld [vmem:[#allocation2 + $0x90] sm:$0xff]  ;;  %v946_v10 = vld [vmem:[#allocation2 + $0x20] sm:$0xff]  ;;  %v669_v23 = vshrl.u32 %v668_v2, 7  ;;  %v247_v36 = vmax.f32 %v936_v3, %v39_v7  ;;  %vm810_vm3 = vcmask 1047559   ;;  %s913_s0 = smov [#allocation5]  }
  0x16   :  { %v948_v11 = vld [vmem:[#allocation2 + $0x28] sm:$0xff]  ;;  %v950_v12 = vld [vmem:[#allocation2 + $0x98] sm:$0xff]  ;;  %v952_v13 = vld [vmem:[#allocation2 + $0xa0] sm:$0xff]  ;;  %v667_v22 = vunpack.c.0.s8 %v666_v1  ;;  %v248_v37 = vmax.f32 %v938_v4, %v40_v8  ;;  %v249_v45 = vmax.f32 %v940_v5, %v944_v9  ;;  %s847_s20 = sshll.u32 %s913_s0, 4  ;;  %s848_s20 = int_to_ptr.vmem [resolvable:$true] %s847_s20 }
  0x17   :  { %v954_v14 = vld [vmem:[#allocation2 + $0xa8] sm:$0xff]  ;;  %v956_v15 = vld [vmem:[#allocation2 + $0x30] sm:$0xff]  ;;  %v958_v16 = vld [vmem:[#allocation2 + $0x38] sm:$0xff]  ;;  %v250_v46 = vmax.f32 %v942_v6, %v950_v12  ;;  %v251_v50 = vmax.f32 %v946_v10, %v952_v13  ;;  %s883_s21 = scalar_lea.vmem %s848_s20, 512  ;;  %p888_p9 = scmp.lt.s32.totalorder %s848_s20, %s848_s20 }
  0x18   :  { %v960_v17 = vld [vmem:[#allocation2 + $0x40] sm:$0xff]  ;;  %v962_v18 = vld [vmem:[#allocation2 + $0x48] sm:$0xff]  ;;  %v964_v19 = vld [vmem:[#allocation2 + $0xb0] sm:$0xff]  ;;  %v252_v51 = vmax.f32 %v948_v11, %v954_v14  ;;  %v1006_v52 = vsub.s32 %v667_v22, %v669_v23  ;;  %p884_p8 = scmp.ne.s32.totalorder %s848_s20, %s883_s21  ;;  %p889_p10 = scmp.lt.s32.totalorder %s883_s21, %s883_s21 }
  0x19   :  { %v966_v20 = vld [vmem:[#allocation2 + $0xb8] sm:$0xff]  ;;  %v968_v21 = vld [vmem:[#allocation2 + $0xc0] sm:$0xff]  ;;  %v970_v24 = vld [vmem:[#allocation2 + $0x50] sm:$0xff]  ;;  %v253_v56 = vmax.f32 %v956_v15, %v964_v19 }
  0x1a   :  { %v972_v25 = vld [vmem:[#allocation2 + $0x58] sm:$0xff]  ;;  %v974_v26 = vld [vmem:[#allocation2 + $0xc8] sm:$0xff]  ;;  %v976_v27 = vld [vmem:[#allocation2 + $0xd0] sm:$0xff]  ;;  %v254_v57 = vmax.f32 %v958_v16, %v966_v20  ;;  %v255_v58 = vmax.f32 %v960_v17, %v968_v21  ;;  %p890_p11 = por %p889_p10, %p888_p9 }
  0x1b   :  { %v978_v28 = vld [vmem:[#allocation2 + $0xd8] sm:$0xff]  ;;  %v980_v29 = vld [vmem:[#allocation2 + $0x60] sm:$0xff]  ;;  %v982_v30 = vld [vmem:[#allocation2 + $0x68] sm:$0xff]  ;;  %v256_v59 = vmax.f32 %v962_v18, %v974_v26  ;;  %v257_v1 = vmax.f32 %v970_v24, %v976_v27 }
  0x1c   :  { %v984_v31 = vld [vmem:[#allocation2 + $0xe0] sm:$0xff]  ;;  %v986_v32 = vld [vmem:[#allocation2 + $0xe8] sm:$0xff]  ;;  %v57_v35 = vld [vmem:[#allocation2 + $0x110] sm:$0xff]  ;;  %v258_v2 = vmax.f32 %v972_v25, %v978_v28  ;;  %p891_p12 = pnand %p890_p11, %p884_p8 }
  0x1d   :  { %v55_v33 = vld [vmem:[#allocation2 + $0x100] sm:$0xff]  ;;  %v56_v34 = vld [vmem:[#allocation2 + $0x108] sm:$0xff]  ;;  %v990_v38 = vld [vmem:[#allocation2 + $0x70] sm:$0xff]  ;;  %v259_v10 = vmax.f32 %v980_v29, %v984_v31  ;;  %v260_v11 = vmax.f32 %v982_v30, %v986_v32  ;;  %v281_v12 = vmax.f32 %v249_v45, %v57_v35 }
  0x1e   :  { %v992_v39 = vld [vmem:[#allocation2 + $0x78] sm:$0xff]  ;;  %v994_v40 = vld [vmem:[#allocation2 + $0xf0] sm:$0xff]  ;;  %v59_v43 = vld [vmem:[#allocation2 + $0x120] sm:$0xff]  ;;  %v279_v3 = vmax.f32 %v247_v36, %v55_v33  ;;  %v280_v4 = vmax.f32 %v248_v37, %v56_v34 }
  0x1f   :  { %v996_v41 = vld [vmem:[#allocation2 + $0xf8] sm:$0xff]  ;;  %v60_v44 = vld [vmem:[#allocation2 + $0x128] sm:$0xff]  ;;  %v61_v47 = vld [vmem:[#allocation2 + $0x130] sm:$0xff]  ;;  %v261_v17 = vmax.f32 %v990_v38, %v994_v40  ;;  %v283_v19 = vmax.f32 %v251_v50, %v59_v43 }
  0x20   :  { %v58_v42 = vld [vmem:[#allocation2 + $0x118] sm:$0xff]  ;;  %v63_v49 = vld [vmem:[#allocation2 + $0x140] sm:$0xff]  ;;  %v64_v53 = vld [vmem:[#allocation2 + $0x148] sm:$0xff]  ;;  %v262_v18 = vmax.f32 %v992_v39, %v996_v41  ;;  %v284_v20 = vmax.f32 %v252_v51, %v60_v44  ;;  %v285_v24 = vmax.f32 %v253_v56, %v61_v47 }
  0x21   :  { %v62_v48 = vld [vmem:[#allocation2 + $0x138] sm:$0xff]  ;;  %v65_v54 = vld [vmem:[#allocation2 + $0x150] sm:$0xff]  ;;  %v67_v60 = vld [vmem:[#allocation2 + $0x160] sm:$0xff]  ;;  %v282_v13 = vmax.f32 %v250_v46, %v58_v42  ;;  %v287_v26 = vmax.f32 %v255_v58, %v63_v49  ;;  %v288_v27 = vmax.f32 %v256_v59, %v64_v53 }
  0x22   :  { %v66_v55 = vld [vmem:[#allocation2 + $0x158] sm:$0xff]  ;;  %v68_v61 = vld [vmem:[#allocation2 + $0x168] sm:$0xff]  ;;  %v1016_v62 = vld [vmem:[#allocation2 + $0x180] sm:$0xff]  ;;  %v286_v25 = vmax.f32 %v254_v57, %v62_v48  ;;  %v289_v32 = vmax.f32 %v257_v1, %v65_v54  ;;  %v291_v41 = vmax.f32 %v259_v10, %v67_v60 }
  0x23   :  { %v1018_v63 = vld [vmem:[#allocation2 + $0x188] sm:$0xff]  ;;  %v1020_v0 = vld [vmem:[#allocation2 + $0x190] sm:$0xff]  ;;  %v70_v6 = vld [vmem:[#allocation2 + $0x178] sm:$0xff]  ;;  %v290_v33 = vmax.f32 %v258_v2, %v66_v55  ;;  %v311_v34 = vmax.f32 %v279_v3, %v1016_v62  ;;  %v292_v42 = vmax.f32 %v260_v11, %v68_v61 }
  0x24   :  { %v69_v5 = vld [vmem:[#allocation2 + $0x170] sm:$0xff]  ;;  %v1026_v7 = vld [vmem:[#allocation2 + $0x198] sm:$0xff]  ;;  %v1028_v8 = vld [vmem:[#allocation2 + $0x1a0] sm:$0xff]  ;;  %v312_v35 = vmax.f32 %v280_v4, %v1018_v63  ;;  %v313_v43 = vmax.f32 %v281_v12, %v1020_v0  ;;  %v294_v49 = vmax.f32 %v262_v18, %v70_v6 }
  0x25   :  { %v1030_v9 = vld [vmem:[#allocation2 + $0x1a8] sm:$0xff]  ;;  %v1036_v14 = vld [vmem:[#allocation2 + $0x1b0] sm:$0xff]  ;;  %v1038_v15 = vld [vmem:[#allocation2 + $0x1b8] sm:$0xff]  ;;  %v314_v44 = vmax.f32 %v282_v13, %v1026_v7  ;;  %v293_v48 = vmax.f32 %v261_v17, %v69_v5  ;;  %v315_v50 = vmax.f32 %v283_v19, %v1028_v8 }
  0x26   :  { %v1040_v16 = vld [vmem:[#allocation2 + $0x1c0] sm:$0xff]  ;;  %v1046_v21 = vld [vmem:[#allocation2 + $0x1c8] sm:$0xff]  ;;  %v1048_v22 = vld [vmem:[#allocation2 + $0x1d0] sm:$0xff]  ;;  %v316_v51 = vmax.f32 %v284_v20, %v1030_v9  ;;  %v317_v56 = vmax.f32 %v285_v24, %v1036_v14  ;;  %v318_v57 = vmax.f32 %v286_v25, %v1038_v15 }
  0x27   :  { %v1050_v23 = vld [vmem:[#allocation2 + $0x1d8] sm:$0xff]  ;;  %v1052_v28 = vld [vmem:[#allocation2 + $0x1e0] sm:$0xff]  ;;  %v1054_v29 = vld [vmem:[#allocation2 + $0x1e8] sm:$0xff]  ;;  %v319_v58 = vmax.f32 %v287_v26, %v1040_v16  ;;  %v320_v59 = vmax.f32 %v288_v27, %v1046_v21  ;;  %v321_v63 = vmax.f32 %v289_v32, %v1048_v22 }
  0x28   :  { %v87_v30 = vld [vmem:[#allocation2 + $0x200] sm:$0xff]  ;;  %v88_v31 = vld [vmem:[#allocation2 + $0x208] sm:$0xff]  ;;  %v1058_v36 = vld [vmem:[#allocation2 + $0x1f0] sm:$0xff]  ;;  %v322_v0 = vmax.f32 %v290_v33, %v1050_v23  ;;  %v323_v6 = vmax.f32 %v291_v41, %v1052_v28  ;;  %v324_v7 = vmax.f32 %v292_v42, %v1054_v29 }
  0x29   :  { %v1060_v37 = vld [vmem:[#allocation2 + $0x1f8] sm:$0xff]  ;;  %v89_v38 = vld [vmem:[#allocation2 + $0x210] sm:$0xff]  ;;  %v91_v40 = vld [vmem:[#allocation2 + $0x220] sm:$0xff]  ;;  %v343_v1 = vmax.f32 %v311_v34, %v87_v30  ;;  %v344_v2 = vmax.f32 %v312_v35, %v88_v31  ;;  %v325_v13 = vmax.f32 %v293_v48, %v1058_v36 }
  0x2a   :  { %v90_v39 = vld [vmem:[#allocation2 + $0x218] sm:$0xff]  ;;  %v92_v45 = vld [vmem:[#allocation2 + $0x228] sm:$0xff]  ;;  %v93_v46 = vld [vmem:[#allocation2 + $0x230] sm:$0xff]  ;;  %v345_v8 = vmax.f32 %v313_v43, %v89_v38  ;;  %v326_v14 = vmax.f32 %v294_v49, %v1060_v37  ;;  %v347_v15 = vmax.f32 %v315_v50, %v91_v40 }
  0x2b   :  { %v94_v47 = vld [vmem:[#allocation2 + $0x238] sm:$0xff]  ;;  %v95_v53 = vld [vmem:[#allocation2 + $0x240] sm:$0xff]  ;;  %v96_v54 = vld [vmem:[#allocation2 + $0x248] sm:$0xff]  ;;  %v346_v9 = vmax.f32 %v314_v44, %v90_v39  ;;  %v348_v16 = vmax.f32 %v316_v51, %v92_v45  ;;  %v349_v20 = vmax.f32 %v317_v56, %v93_v46 }
  0x2c   :  { %v97_v55 = vld [vmem:[#allocation2 + $0x250] sm:$0xff]  ;;  %v98_v60 = vld [vmem:[#allocation2 + $0x258] sm:$0xff]  ;;  %v99_v61 = vld [vmem:[#allocation2 + $0x260] sm:$0xff]  ;;  %v350_v21 = vmax.f32 %v318_v57, %v94_v47  ;;  %v351_v22 = vmax.f32 %v319_v58, %v95_v53  ;;  %v352_v23 = vmax.f32 %v320_v59, %v96_v54 }
  0x2d   :  { %v100_v62 = vld [vmem:[#allocation2 + $0x268] sm:$0xff]  ;;  %v101_v3 = vld [vmem:[#allocation2 + $0x270] sm:$0xff]  ;;  %v102_v4 = vld [vmem:[#allocation2 + $0x278] sm:$0xff]  ;;  %v353_v27 = vmax.f32 %v321_v63, %v97_v55  ;;  %v354_v28 = vmax.f32 %v322_v0, %v98_v60  ;;  %v355_v34 = vmax.f32 %v323_v6, %v99_v61 }
  0x2e   :  { %v103_v5 = vld [vmem:[#allocation2 + $0x280] sm:$0xff]  ;;  %v104_v10 = vld [vmem:[#allocation2 + $0x288] sm:$0xff]  ;;  %v105_v11 = vld [vmem:[#allocation2 + $0x290] sm:$0xff]  ;;  %v1076_v35 = vmax.f32 %v324_v7, %v100_v62  ;;  %v1084_v41 = vmax.f32 %v325_v13, %v101_v3  ;;  %v1086_v42 = vmax.f32 %v326_v14, %v102_v4 }
  0x2f   :  { %v106_v12 = vld [vmem:[#allocation2 + $0x298] sm:$0xff]  ;;  %v107_v17 = vld [vmem:[#allocation2 + $0x2a0] sm:$0xff]  ;;  %v108_v18 = vld [vmem:[#allocation2 + $0x2a8] sm:$0xff]  ;;  %v375_v29 = vmax.f32 %v343_v1, %v103_v5  ;;  %v376_v30 = vmax.f32 %v344_v2, %v104_v10  ;;  %v377_v36 = vmax.f32 %v345_v8, %v105_v11 }
  0x30   :  { %v109_v19 = vld [vmem:[#allocation2 + $0x2b0] sm:$0xff]  ;;  %v110_v24 = vld [vmem:[#allocation2 + $0x2b8] sm:$0xff]  ;;  %v111_v25 = vld [vmem:[#allocation2 + $0x2c0] sm:$0xff]  ;;  %v378_v37 = vmax.f32 %v346_v9, %v106_v12  ;;  %v379_v43 = vmax.f32 %v347_v15, %v107_v17  ;;  %v380_v44 = vmax.f32 %v348_v16, %v108_v18 }
  0x31   :  { %v112_v26 = vld [vmem:[#allocation2 + $0x2c8] sm:$0xff]  ;;  %v113_v31 = vld [vmem:[#allocation2 + $0x2d0] sm:$0xff]  ;;  %v114_v32 = vld [vmem:[#allocation2 + $0x2d8] sm:$0xff]  ;;  %v381_v48 = vmax.f32 %v349_v20, %v109_v19  ;;  %v382_v49 = vmax.f32 %v350_v21, %v110_v24  ;;  %v383_v50 = vmax.f32 %v351_v22, %v111_v25 }
  0x32   :  { %v115_v33 = vld [vmem:[#allocation2 + $0x2e0] sm:$0xff]  ;;  %v1078_v38 = vld [vmem:[#allocation2 + $0x2e8] sm:$0xff]  ;;  %v1080_v39 = vld [vmem:[#allocation2 + $0x2f0] sm:$0xff]  ;;  %v384_v51 = vmax.f32 %v352_v23, %v112_v26  ;;  %v385_v56 = vmax.f32 %v353_v27, %v113_v31  ;;  %v386_v57 = vmax.f32 %v354_v28, %v114_v32 }
  0x33   :  { %v1082_v40 = vld [vmem:[#allocation2 + $0x2f8] sm:$0xff]  ;;  %v119_v45 = vld [vmem:[#allocation2 + $0x300] sm:$0xff]  ;;  %v120_v46 = vld [vmem:[#allocation2 + $0x308] sm:$0xff]  ;;  %v387_v63 = vmax.f32 %v355_v34, %v115_v33  ;;  %v388_v0 = vmax.f32 %v1076_v35, %v1078_v38  ;;  %v389_v6 = vmax.f32 %v1084_v41, %v1080_v39 }
  0x34   :  { %v121_v47 = vld [vmem:[#allocation2 + $0x310] sm:$0xff]  ;;  %v122_v53 = vld [vmem:[#allocation2 + $0x318] sm:$0xff]  ;;  %v123_v54 = vld [vmem:[#allocation2 + $0x320] sm:$0xff]  ;;  %v407_v58 = vmax.f32 %v375_v29, %v119_v45  ;;  %v408_v59 = vmax.f32 %v376_v30, %v120_v46  ;;  %v390_v11 = vmax.f32 %v1086_v42, %v1082_v40 }
  0x35   :  { %v124_v55 = vld [vmem:[#allocation2 + $0x328] sm:$0xff]  ;;  %v125_v60 = vld [vmem:[#allocation2 + $0x330] sm:$0xff]  ;;  %v126_v61 = vld [vmem:[#allocation2 + $0x338] sm:$0xff]  ;;  %v409_v1 = vmax.f32 %v377_v36, %v121_v47  ;;  %v410_v2 = vmax.f32 %v378_v37, %v122_v53  ;;  %v411_v7 = vmax.f32 %v379_v43, %v123_v54 }
  0x36   :  { %v127_v62 = vld [vmem:[#allocation2 + $0x340] sm:$0xff]  ;;  %v128_v3 = vld [vmem:[#allocation2 + $0x348] sm:$0xff]  ;;  %v129_v4 = vld [vmem:[#allocation2 + $0x350] sm:$0xff]  ;;  %v412_v8 = vmax.f32 %v380_v44, %v124_v55  ;;  %v439_v9 = vrot.slane %v407_v58, 4  ;;  %v413_v12 = vmax.f32 %v381_v48, %v125_v60  ;;  %v1094_v13 = vmax.f32 %v382_v49, %v126_v61 }
  0x37   :  { %v130_v5 = vld [vmem:[#allocation2 + $0x358] sm:$0xff]  ;;  %v131_v10 = vld [vmem:[#allocation2 + $0x360] sm:$0xff]  ;;  %v445_v14 = vrot.slane %v408_v59, 4  ;;  %v1096_v15 = vmax.f32 %v383_v50, %v127_v62  ;;  %v1098_v16 = vmax.f32 %v384_v51, %v128_v3  ;;  %v1100_v17 = vmax.f32 %v385_v56, %v129_v4  ;;  %v132_v19 = vld [vmem:[#allocation2 + $0x368] sm:$0xff] }
  0x38   :  { %v440_v18 = vmax.f32 %v407_v58, %v439_v9  ;;  %v1102_v20 = vmax.f32 %v386_v57, %v130_v5  ;;  %v451_v22 = vrot.slane %v409_v1, 4  ;;  %v457_v23 = vrot.slane %v410_v2, 4  ;;  %v133_v24 = vld [vmem:[#allocation2 + $0x370] sm:$0xff]  ;;  %v134_v25 = vld [vmem:[#allocation2 + $0x378] sm:$0xff]  ;;  %v1104_v26 = vld [vmem:[#allocation2 + $0x380] sm:$0xff] }
  0x39   :  { %v446_v21 = vmax.f32 %v408_v59, %v445_v14  ;;  %v1106_v27 = vmax.f32 %v387_v63, %v131_v10  ;;  %v463_v29 = vrot.slane %v411_v7, 4  ;;  %v469_v30 = vrot.slane %v412_v8, 4  ;;  %v1108_v31 = vld [vmem:[#allocation2 + $0x388] sm:$0xff]  ;;  %v1110_v32 = vld [vmem:[#allocation2 + $0x390] sm:$0xff]  ;;  %v1112_v33 = vld [vmem:[#allocation2 + $0x398] sm:$0xff] }
  0x3a   :  { %v441_v28 = vrot.slane %v440_v18, 2  ;;  %v1114_v34 = vld [vmem:[#allocation2 + $0x3a0] sm:$0xff]  ;;  %v452_v36 = vmax.f32 %v409_v1, %v451_v22  ;;  %v1116_v37 = vmax.f32 %v410_v2, %v457_v23  ;;  %v475_v38 = vrot.slane %v413_v12, 4  ;;  %v1118_v39 = vld [vmem:[#allocation2 + $0x3a8] sm:$0xff]  ;;  %v1120_v40 = vld [vmem:[#allocation2 + $0x3b0] sm:$0xff] }
  0x3b   :  { %v447_v35 = vrot.slane %v446_v21, 2  ;;  %v1122_v41 = vld [vmem:[#allocation2 + $0x3b8] sm:$0xff]  ;;  %v1124_v42 = vmax.f32 %v388_v0, %v132_v19  ;;  %v1126_v44 = vmax.f32 %v411_v7, %v463_v29  ;;  %v1128_v45 = vmax.f32 %v412_v8, %v469_v30  ;;  %v1130_v46 = vld [vmem:[#allocation2 + $0x3c0] sm:$0xff]  ;;  %v1132_v47 = vld [vmem:[#allocation2 + $0x3c8] sm:$0xff] }
  0x3c   :  { %v442_v43 = vmax.f32 %v440_v18, %v441_v28  ;;  %v1134_v48 = vld [vmem:[#allocation2 + $0x400] sm:$0xff]  ;;  %v1136_v49 = vmax.f32 %v389_v6, %v133_v24  ;;  %v1138_v50 = vmax.f32 %v390_v11, %v134_v25  ;;  %v481_v53 = vrot.slane %v1094_v13, 4  ;;  %v1141_v54 = vld [vmem:[#allocation2 + $0x3d0] sm:$0xff]  ;;  %v1143_v55 = vld [vmem:[#allocation2 + $0x3d8] sm:$0xff] }
  0x3d   :  { %v448_v51 = vmax.f32 %v446_v21, %v447_v35  ;;  %v1145_v56 = vld [vmem:[#allocation2 + $0x3e0] sm:$0xff]  ;;  %v152_v57 = vld [vmem:[#allocation2 + $0x408] sm:$0xff]  ;;  %v153_v58 = vld [vmem:[#allocation2 + $0x410] sm:$0xff]  ;;  %v453_v61 = vrot.slane %v452_v36, 2  ;;  %v459_v62 = vrot.slane %v1116_v37, 2  ;;  %v1148_v63 = vmax.f32 %v413_v12, %v475_v38 }
  0x3e   :  { %v154_v59 = vld [vmem:[#allocation2 + $0x418] sm:$0xff]  ;;  %v443_v60 = vrot.slane %v442_v43, 1  ;;  %v1150_v0 = vld [vmem:[#allocation2 + $0x3e8] sm:$0xff]  ;;  %v1152_v1 = vld [vmem:[#allocation2 + $0x3f0] sm:$0xff]  ;;  %v263_v6 = vmax.f32 %v1104_v26, %v1134_v48  ;;  %v465_v8 = vrot.slane %v1126_v44, 2  ;;  %v471_v9 = vrot.slane %v1128_v45, 2 }
  0x3f   :  { %v1154_v2 = vld [vmem:[#allocation2 + $0x3f8] sm:$0xff]  ;;  %v155_v3 = vld [vmem:[#allocation2 + $0x420] sm:$0xff]  ;;  %v156_v4 = vld [vmem:[#allocation2 + $0x428] sm:$0xff]  ;;  %v449_v7 = vrot.slane %v448_v51, 1  ;;  %v264_v14 = vmax.f32 %v1108_v31, %v152_v57  ;;  %v265_v18 = vmax.f32 %v1110_v32, %v153_v58  ;;  %v266_v19 = vmax.f32 %v1112_v33, %v154_v59 }
  0x40   :  { %v157_v5 = vld [vmem:[#allocation2 + $0x430] sm:$0xff]  ;;  %v158_v10 = vld [vmem:[#allocation2 + $0x438] sm:$0xff]  ;;  %v159_v11 = vld [vmem:[#allocation2 + $0x440] sm:$0xff]  ;;  %v267_v21 = vmax.f32 %v1114_v34, %v155_v3  ;;  %v268_v25 = vmax.f32 %v1118_v39, %v156_v4  ;;  %v1167_v29 = vmax.f32 %v442_v43, %v443_v60  ;;  %v454_v34 = vmax.f32 %v452_v36, %v453_v61 }
  0x41   :  { %v160_v12 = vld [vmem:[#allocation2 + $0x448] sm:$0xff]  ;;  %v161_v22 = vld [vmem:[#allocation2 + $0x450] sm:$0xff]  ;;  %v162_v23 = vld [vmem:[#allocation2 + $0x458] sm:$0xff]  ;;  %v269_v26 = vmax.f32 %v1120_v40, %v157_v5  ;;  %v270_v28 = vmax.f32 %v1122_v41, %v158_v10  ;;  %v271_v32 = vmax.f32 %v1130_v46, %v159_v11  ;;  %v1171_v38 = vmax.f32 %v448_v51, %v449_v7 }
  0x42   :  { %v163_v24 = vld [vmem:[#allocation2 + $0x460] sm:$0xff]  ;;  %v164_v30 = vld [vmem:[#allocation2 + $0x468] sm:$0xff]  ;;  %v165_v35 = vld [vmem:[#allocation2 + $0x470] sm:$0xff]  ;;  %v272_v33 = vmax.f32 %v1132_v47, %v160_v12  ;;  %v273_v39 = vmax.f32 %v1141_v54, %v161_v22  ;;  %v274_v40 = vmax.f32 %v1143_v55, %v162_v23  ;;  %v460_v43 = vmax.f32 %v1116_v37, %v459_v62 }
  0x43   :  { %v166_v31 = vld [vmem:[#allocation2 + $0x478] sm:$0xff]  ;;  %v167_v48 = vld [vmem:[#allocation2 + $0x480] sm:$0xff]  ;;  %v168_v57 = vld [vmem:[#allocation2 + $0x488] sm:$0xff]  ;;  %v275_v41 = vmax.f32 %v1145_v56, %v163_v24  ;;  %v276_v46 = vmax.f32 %v1150_v0, %v164_v30  ;;  %v277_v47 = vmax.f32 %v1152_v1, %v165_v35  ;;  %v455_v51 = vrot.slane %v454_v34, 1 }
  0x44   :  { %v169_v58 = vld [vmem:[#allocation2 + $0x490] sm:$0xff]  ;;  %v170_v59 = vld [vmem:[#allocation2 + $0x498] sm:$0xff]  ;;  %v171_v60 = vld [vmem:[#allocation2 + $0x4a0] sm:$0xff]  ;;  %v278_v36 = vmax.f32 %v1154_v2, %v166_v31  ;;  %v1180_v54 = vmax.f32 %v263_v6, %v167_v48  ;;  %v1182_v55 = vmax.f32 %v264_v14, %v168_v57  ;;  %v461_v37 = vrot.slane %v460_v43, 1 }
  0x45   :  { %v172_v3 = vld [vmem:[#allocation2 + $0x4a8] sm:$0xff]  ;;  %v173_v61 = vld [vmem:[#allocation2 + $0x4b0] sm:$0xff]  ;;  %v174_v4 = vld [vmem:[#allocation2 + $0x4b8] sm:$0xff]  ;;  %v1184_v56 = vmax.f32 %v265_v18, %v169_v58  ;;  %v1186_v11 = vmax.f32 %v266_v19, %v170_v59  ;;  %v1188_v0 = vmax.f32 %v267_v21, %v171_v60  ;;  %v1200_v24 = vmax.f32 %v454_v34, %v455_v51 }
  0x46   :  { %v175_v5 = vld [vmem:[#allocation2 + $0x4c0] sm:$0xff]  ;;  %v176_v62 = vld [vmem:[#allocation2 + $0x4c8] sm:$0xff]  ;;  %v177_v7 = vld [vmem:[#allocation2 + $0x4d0] sm:$0xff]  ;;  %v1190_v1 = vmax.f32 %v268_v25, %v172_v3  ;;  %v1192_v2 = vmax.f32 %v269_v26, %v173_v61  ;;  %v1194_v23 = vmax.f32 %v270_v28, %v174_v4  ;;  %v1206_v26 = vmax.f32 %v460_v43, %v461_v37 }
  0x47   :  { %v178_v10 = vld [vmem:[#allocation2 + $0x4d8] sm:$0xff]  ;;  %v179_v12 = vld [vmem:[#allocation2 + $0x4e0] sm:$0xff]  ;;  %v180_v22 = vld [vmem:[#allocation2 + $0x4e8] sm:$0xff]  ;;  %v1196_v14 = vmax.f32 %v271_v32, %v175_v5  ;;  %v1198_v18 = vmax.f32 %v272_v33, %v176_v62  ;;  %v1202_v21 = vmax.f32 %v273_v39, %v177_v7  ;;  %v466_v28 = vmax.f32 %v1126_v44, %v465_v8 }
  0x48   :  { %v181_v6 = vld [vmem:[#allocation2 + $0x4f0] sm:$0xff]  ;;  %v182_v30 = vld [vmem:[#allocation2 + $0x4f8] sm:$0xff]  ;;  %v183_v19 = vld [vmem:[#allocation2 + $0x500] sm:$0xff]  ;;  %v1204_v25 = vmax.f32 %v274_v40, %v178_v10  ;;  %v1211_v33 = vmax.f32 %v275_v41, %v179_v12  ;;  %v1213_v34 = vmax.f32 %v276_v46, %v180_v22  ;;  %v472_v58 = vmax.f32 %v1128_v45, %v471_v9 }
  0x49   :  { %v184_v35 = vld [vmem:[#allocation2 + $0x508] sm:$0xff]  ;;  %v185_v31 = vld [vmem:[#allocation2 + $0x510] sm:$0xff]  ;;  %v186_v32 = vld [vmem:[#allocation2 + $0x518] sm:$0xff]  ;;  %v1215_v57 = vmax.f32 %v277_v47, %v181_v6  ;;  %v1220_v59 = vmax.f32 %v278_v36, %v182_v30  ;;  %v327_v44 = vmax.f32 %v1180_v54, %v183_v19  ;;  %v467_v60 = vrot.slane %v466_v28, 1 }
  0x4a   :  { %v187_v48 = vld [vmem:[#allocation2 + $0x520] sm:$0xff]  ;;  %v188_v39 = vld [vmem:[#allocation2 + $0x528] sm:$0xff]  ;;  %v189_v40 = vld [vmem:[#allocation2 + $0x530] sm:$0xff]  ;;  %v328_v8 = vmax.f32 %v1182_v55, %v184_v35  ;;  %v329_v47 = vmax.f32 %v1184_v56, %v185_v31  ;;  %v330_v51 = vmax.f32 %v1186_v11, %v186_v32  ;;  %v473_v45 = vrot.slane %v472_v58, 1 }
  0x4b   :  { %v190_v43 = vld [vmem:[#allocation2 + $0x538] sm:$0xff]  ;;  %v191_v41 = vld [vmem:[#allocation2 + $0x540] sm:$0xff]  ;;  %v192_v3 = vld [vmem:[#allocation2 + $0x548] sm:$0xff]  ;;  %v331_v61 = vmax.f32 %v1188_v0, %v187_v48  ;;  %v332_v36 = vmax.f32 %v1190_v1, %v188_v39  ;;  %v333_v54 = vmax.f32 %v1192_v2, %v189_v40  ;;  %v1234_v12 = vmax.f32 %v466_v28, %v467_v60 }
  0x4c   :  { %v193_v46 = vld [vmem:[#allocation2 + $0x550] sm:$0xff]  ;;  %v194_v9 = vld [vmem:[#allocation2 + $0x558] sm:$0xff]  ;;  %v195_v4 = vld [vmem:[#allocation2 + $0x560] sm:$0xff]  ;;  %v334_v55 = vmax.f32 %v1194_v23, %v190_v43  ;;  %v335_v37 = vmax.f32 %v1196_v14, %v191_v41  ;;  %v336_v56 = vmax.f32 %v1198_v18, %v192_v3  ;;  %v1238_v30 = vmax.f32 %v472_v58, %v473_v45 }
  0x4d   :  { %v196_v5 = vld [vmem:[#allocation2 + $0x568] sm:$0xff]  ;;  %v197_v62 = vld [vmem:[#allocation2 + $0x570] sm:$0xff]  ;;  %v198_v7 = vld [vmem:[#allocation2 + $0x578] sm:$0xff]  ;;  %v337_v11 = vmax.f32 %v1202_v21, %v193_v46  ;;  %v338_v0 = vmax.f32 %v1204_v25, %v194_v9  ;;  %v339_v2 = vmax.f32 %v1211_v33, %v195_v4  ;;  %v477_v14 = vrot.slane %v1148_v63, 2 }
  0x4e   :  { %v199_v10 = vld [vmem:[#allocation2 + $0x580] sm:$0xff]  ;;  %v200_v22 = vld [vmem:[#allocation2 + $0x588] sm:$0xff]  ;;  %v201_v6 = vld [vmem:[#allocation2 + $0x590] sm:$0xff]  ;;  %v340_v23 = vmax.f32 %v1213_v34, %v196_v5  ;;  %v341_v21 = vmax.f32 %v1215_v57, %v197_v62  ;;  %v342_v25 = vmax.f32 %v1220_v59, %v198_v7  ;;  %v482_v31 = vmax.f32 %v1094_v13, %v481_v53 }
  0x4f   :  { %v202_v1 = vld [vmem:[#allocation2 + $0x598] sm:$0xff]  ;;  %v203_v19 = vld [vmem:[#allocation2 + $0x5a0] sm:$0xff]  ;;  %v204_v35 = vld [vmem:[#allocation2 + $0x5a8] sm:$0xff]  ;;  %v1243_v28 = vmax.f32 %v327_v44, %v199_v10  ;;  %v1248_v34 = vmax.f32 %v328_v8, %v200_v22  ;;  %v1250_v58 = vmax.f32 %v329_v47, %v201_v6  ;;  %v478_v40 = vmax.f32 %v1148_v63, %v477_v14 }
  0x50   :  { %v205_v18 = vld [vmem:[#allocation2 + $0x5b0] sm:$0xff]  ;;  %v206_v32 = vld [vmem:[#allocation2 + $0x5b8] sm:$0xff]  ;;  %v207_v48 = vld [vmem:[#allocation2 + $0x5c0] sm:$0xff]  ;;  %v1252_v39 = vmax.f32 %v330_v51, %v202_v1  ;;  %v1255_v44 = vmax.f32 %v331_v61, %v203_v19  ;;  %v1257_v60 = vmax.f32 %v332_v36, %v204_v35  ;;  %v483_v13 = vrot.slane %v482_v31, 2 }
  0x51   :  { %v208_v33 = vld [vmem:[#allocation2 + $0x5c8] sm:$0xff]  ;;  %v209_v57 = vld [vmem:[#allocation2 + $0x5d0] sm:$0xff]  ;;  %v210_v43 = vld [vmem:[#allocation2 + $0x5d8] sm:$0xff]  ;;  %v1259_v41 = vmax.f32 %v333_v54, %v205_v18  ;;  %v1261_v46 = vmax.f32 %v334_v55, %v206_v32  ;;  %v1263_v47 = vmax.f32 %v335_v37, %v207_v48  ;;  %v479_v63 = vrot.slane %v478_v40, 1 }
  0x52   :  { %v211_v59 = vld [vmem:[#allocation2 + $0x5e0] sm:$0xff]  ;;  %v212_v53 = vld [vmem:[#allocation2 + $0x5e8] sm:$0xff]  ;;  %v213_v3 = vld [vmem:[#allocation2 + $0x5f0] sm:$0xff]  ;;  %v1265_v51 = vmax.f32 %v336_v56, %v208_v33  ;;  %v1267_v61 = vmax.f32 %v337_v11, %v209_v57  ;;  %v1269_v5 = vmax.f32 %v338_v0, %v210_v43  ;;  %v484_v54 = vmax.f32 %v482_v31, %v483_v13 }
  0x53   :  { %v214_v8 = vld [vmem:[#allocation2 + $0x5f8] sm:$0xff]  ;;  %v215_v45 = vld [vmem:[#allocation2 + $0x600] sm:$0xff]  ;;  %v216_v9 = vld [vmem:[#allocation2 + $0x608] sm:$0xff]  ;;  %v1271_v36 = vmax.f32 %v339_v2, %v211_v59  ;;  %v1273_v55 = vmax.f32 %v340_v23, %v212_v53  ;;  %v1275_v37 = vmax.f32 %v341_v21, %v213_v3  ;;  %v1282_v14 = vmax.f32 %v478_v40, %v479_v63 }
  0x54   :  { %v217_v4 = vld [vmem:[#allocation2 + $0x610] sm:$0xff]  ;;  %v218_v62 = vld [vmem:[#allocation2 + $0x618] sm:$0xff]  ;;  %v219_v7 = vld [vmem:[#allocation2 + $0x620] sm:$0xff]  ;;  %v1277_v56 = vmax.f32 %v342_v25, %v214_v8  ;;  %v391_v22 = vmax.f32 %v1243_v28, %v215_v45  ;;  %v392_v0 = vmax.f32 %v1248_v34, %v216_v9  ;;  %v485_v19 = vrot.slane %v484_v54, 1 }
  0x55   :  { %v220_v10 = vld [vmem:[#allocation2 + $0x628] sm:$0xff]  ;;  %v221_v6 = vld [vmem:[#allocation2 + $0x630] sm:$0xff]  ;;  %v222_v1 = vld [vmem:[#allocation2 + $0x638] sm:$0xff]  ;;  %v393_v2 = vmax.f32 %v1250_v58, %v217_v4  ;;  %v394_v21 = vmax.f32 %v1252_v39, %v218_v62  ;;  %v395_v25 = vmax.f32 %v1255_v44, %v219_v7  ;;  %v487_v28 = vrot.slane %v1096_v15, 4 }
  0x56   :  { %v223_v11 = vld [vmem:[#allocation2 + $0x640] sm:$0xff]  ;;  %v224_v35 = vld [vmem:[#allocation2 + $0x648] sm:$0xff]  ;;  %v225_v18 = vld [vmem:[#allocation2 + $0x650] sm:$0xff]  ;;  %v396_v31 = vmax.f32 %v1257_v60, %v220_v10  ;;  %v397_v34 = vmax.f32 %v1259_v41, %v221_v6  ;;  %v398_v58 = vmax.f32 %v1261_v46, %v222_v1  ;;  %v1296_v13 = vmax.f32 %v484_v54, %v485_v19 }
  0x57   :  { %v226_v23 = vld [vmem:[#allocation2 + $0x658] sm:$0xff]  ;;  %v227_v32 = vld [vmem:[#allocation2 + $0x660] sm:$0xff]  ;;  %v228_v48 = vld [vmem:[#allocation2 + $0x668] sm:$0xff]  ;;  %v399_v40 = vmax.f32 %v1263_v47, %v223_v11  ;;  %v400_v57 = vmax.f32 %v1265_v51, %v224_v35  ;;  %v401_v44 = vmax.f32 %v1267_v61, %v225_v18  ;;  %v488_v53 = vmax.f32 %v1096_v15, %v487_v28 }
  0x58   :  { %v229_v33 = vld [vmem:[#allocation2 + $0x670] sm:$0xff]  ;;  %v1292_v43 = vld [vmem:[#allocation2 + $0x678] sm:$0xff]  ;;  %v231_v39 = vld [vmem:[#allocation2 + $0x680] sm:$0xff]  ;;  %v402_v60 = vmax.f32 %v1269_v5, %v226_v23  ;;  %v403_v46 = vmax.f32 %v1271_v36, %v227_v32  ;;  %v404_v47 = vmax.f32 %v1273_v55, %v228_v48  ;;  %v493_v63 = vrot.slane %v1098_v16, 4 }
  0x59   :  { %v232_v59 = vld [vmem:[#allocation2 + $0x688] sm:$0xff]  ;;  %v233_v3 = vld [vmem:[#allocation2 + $0x690] sm:$0xff]  ;;  %v234_v41 = vld [vmem:[#allocation2 + $0x698] sm:$0xff]  ;;  %v405_v51 = vmax.f32 %v1275_v37, %v229_v33  ;;  %v406_v61 = vmax.f32 %v1277_v56, %v1292_v43  ;;  %v423_v5 = vmax.f32 %v391_v22, %v231_v39  ;;  %v489_v15 = vrot.slane %v488_v53, 2 }
  0x5a   :  { %v235_v8 = vld [vmem:[#allocation2 + $0x6a0] sm:$0xff]  ;;  %v236_v45 = vld [vmem:[#allocation2 + $0x6a8] sm:$0xff]  ;;  %v237_v9 = vld [vmem:[#allocation2 + $0x6b0] sm:$0xff]  ;;  %v424_v54 = vmax.f32 %v392_v0, %v232_v59  ;;  %v1305_v6 = vmax.f32 %v393_v2, %v233_v3  ;;  %v1307_v36 = vmax.f32 %v394_v21, %v234_v41  ;;  %v494_v37 = vmax.f32 %v1098_v16, %v493_v63 }
  0x5b   :  { %v238_v4 = vld [vmem:[#allocation2 + $0x6b8] sm:$0xff]  ;;  %v239_v62 = vld [vmem:[#allocation2 + $0x6c0] sm:$0xff]  ;;  %v240_v7 = vld [vmem:[#allocation2 + $0x6c8] sm:$0xff]  ;;  %v1309_v55 = vmax.f32 %v395_v25, %v235_v8  ;;  %v1312_v35 = vmax.f32 %v396_v31, %v236_v45  ;;  %v1314_v18 = vmax.f32 %v397_v34, %v237_v9  ;;  %v490_v25 = vmax.f32 %v488_v53, %v489_v15 }
  0x5c   :  { %v241_v10 = vld [vmem:[#allocation2 + $0x6d0] sm:$0xff]  ;;  %v242_v1 = vld [vmem:[#allocation2 + $0x6d8] sm:$0xff]  ;;  %v243_v11 = vld [vmem:[#allocation2 + $0x6e0] sm:$0xff]  ;;  %v1316_v22 = vmax.f32 %v398_v58, %v238_v4  ;;  %v1318_v0 = vmax.f32 %v399_v40, %v239_v62  ;;  %v1320_v2 = vmax.f32 %v400_v57, %v240_v7  ;;  %v495_v28 = vrot.slane %v494_v37, 2 }
  0x5d   :  { %v244_v19 = vld [vmem:[#allocation2 + $0x6e8] sm:$0xff]  ;;  %v245_v23 = vld [vmem:[#allocation2 + $0x6f0] sm:$0xff]  ;;  %v1322_v21 = vmax.f32 %v401_v44, %v241_v10  ;;  %v1324_v32 = vmax.f32 %v402_v60, %v242_v1  ;;  %v1326_v16 = vmax.f32 %v403_v46, %v243_v11  ;;  %v499_v31 = vrot.slane %v1100_v17, 4  ;;  %v246_v10 = vld [vmem:[#allocation2 + $0x6f8] sm:$0xff] }
  0x5e   :  { %v1328_v48 = vmax.f32 %v404_v47, %v244_v19  ;;  %v496_v33 = vmax.f32 %v494_v37, %v495_v28  ;;  %v505_v34 = vrot.slane %v1102_v20, 4  ;;  %v511_v58 = vrot.slane %v1106_v27, 4 }
  0x5f   :  { %v517_v40 = vrot.slane %v1124_v42, 4  ;;  %v1334_v57 = vmax.f32 %v405_v51, %v245_v23  ;;  %v500_v39 = vmax.f32 %v1100_v17, %v499_v31  ;;  %v523_v59 = vrot.slane %v1136_v49, 4 }
  0x60   :  { %v529_v44 = vrot.slane %v1138_v50, 4  ;;  %v491_v60 = vrot.slane %v490_v25, 1  ;;  %v506_v53 = vmax.f32 %v1102_v20, %v505_v34  ;;  %v512_v3 = vmax.f32 %v1106_v27, %v511_v58 }
  0x61   :  { %v518_v41 = vmax.f32 %v1124_v42, %v517_v40  ;;  %v501_v8 = vrot.slane %v500_v39, 2  ;;  %v524_v46 = vmax.f32 %v1136_v49, %v523_v59  ;;  %v535_v51 = vrot.slane %v423_v5, 4 }
  0x62   :  { %v530_v47 = vmax.f32 %v1138_v50, %v529_v44  ;;  %v497_v63 = vrot.slane %v496_v33, 1  ;;  %v507_v45 = vrot.slane %v506_v53, 2  ;;  %v513_v17 = vrot.slane %v512_v3, 2 }
  0x63   :  { %v519_v9 = vrot.slane %v518_v41, 2  ;;  %v502_v4 = vmax.f32 %v500_v39, %v501_v8  ;;  %v525_v15 = vrot.slane %v524_v46, 2  ;;  %v536_v7 = vmax.f32 %v423_v5, %v535_v51 }
  0x64   :  { %v531_v62 = vrot.slane %v530_v47, 2  ;;  %v508_v20 = vmax.f32 %v506_v53, %v507_v45  ;;  %v514_v37 = vmax.f32 %v512_v3, %v513_v17  ;;  %v541_v1 = vrot.slane %v424_v54, 4 }
  0x65   :  { %v520_v27 = vmax.f32 %v518_v41, %v519_v9  ;;  %v503_v42 = vrot.slane %v502_v4, 1  ;;  %v526_v11 = vmax.f32 %v524_v46, %v525_v15  ;;  %v537_v49 = vrot.slane %v536_v7, 2 }
  0x66   :  { %v532_v19 = vmax.f32 %v530_v47, %v531_v62  ;;  %v509_v23 = vrot.slane %v508_v20, 1  ;;  %v515_v50 = vrot.slane %v514_v37, 1  ;;  %v542_v31 = vmax.f32 %v424_v54, %v541_v1 }
  0x67   :  { %v521_v28 = vrot.slane %v520_v27, 1  ;;  %v1347_v34 = vmax.f32 %v406_v61, %v246_v10  ;;  %v1349_v58 = vmax.f32 %v490_v25, %v491_v60  ;;  %v1351_v5 = vmax.f32 %v496_v33, %v497_v63 }
  0x68   :  { %v527_v40 = vrot.slane %v526_v11, 1  ;;  %v1353_v39 = vmax.f32 %v502_v4, %v503_v42  ;;  %v533_v59 = vrot.slane %v532_v19, 1  ;;  %v538_v44 = vmax.f32 %v536_v7, %v537_v49 }
  0x69   :  { %v543_v53 = vrot.slane %v542_v31, 2  ;;  %v1355_v3 = vmax.f32 %v508_v20, %v509_v23  ;;  %v1357_v41 = vmax.f32 %v514_v37, %v515_v50  ;;  %v1359_v54 = vmax.f32 %v520_v27, %v521_v28 }
  0x6a   :  { %v547_v56 = vrot.slane %v1305_v6, 4  ;;  %v553_v61 = vrot.slane %v1307_v36, 4  ;;  %v559_v25 = vrot.slane %v1309_v55, 4  ;;  %v565_v33 = vrot.slane %v1312_v35, 4 }
  0x6b   :  { %v544_v43 = vmax.f32 %v542_v31, %v543_v53  ;;  %v1365_v60 = vmax.f32 %v526_v11, %v527_v40  ;;  %v571_v46 = vrot.slane %v1314_v18, 4  ;;  %v577_v47 = vrot.slane %v1316_v22, 4 }
  0x6c   :  { %v548_v8 = vmax.f32 %v1305_v6, %v547_v56  ;;  %v539_v51 = vrot.slane %v538_v44, 1  ;;  %v554_v63 = vmax.f32 %v1307_v36, %v553_v61  ;;  %v560_v45 = vmax.f32 %v1309_v55, %v559_v25 }
  0x6d   :  { %v566_v17 = vmax.f32 %v1312_v35, %v565_v33  ;;  %v572_v4 = vmax.f32 %v1314_v18, %v571_v46  ;;  %v578_v15 = vmax.f32 %v1316_v22, %v577_v47  ;;  %v583_v62 = vrot.slane %v1318_v0, 4 }
  0x6e   :  { %v549_v9 = vrot.slane %v548_v8, 2  ;;  %v545_v7 = vrot.slane %v544_v43, 1  ;;  %v555_v6 = vrot.slane %v554_v63, 2  ;;  %v561_v10 = vrot.slane %v560_v45, 2 }
  0x6f   :  { %v567_v20 = vrot.slane %v566_v17, 2  ;;  %v573_v27 = vrot.slane %v572_v4, 2  ;;  %v579_v1 = vrot.slane %v578_v15, 2  ;;  %v584_v36 = vmax.f32 %v1318_v0, %v583_v62 }
  0x70   :  { %v550_v37 = vmax.f32 %v548_v8, %v549_v9  ;;  %v556_v42 = vmax.f32 %v554_v63, %v555_v6  ;;  %v562_v55 = vmax.f32 %v560_v45, %v561_v10  ;;  %v589_v35 = vrot.slane %v1320_v2, 4 }
  0x71   :  { %v568_v11 = vmax.f32 %v566_v17, %v567_v20  ;;  %v574_v18 = vmax.f32 %v572_v4, %v573_v27  ;;  %v580_v23 = vmax.f32 %v578_v15, %v579_v1  ;;  %v585_v22 = vrot.slane %v584_v36, 2 }
  0x72   :  { %v551_v49 = vrot.slane %v550_v37, 1  ;;  %v557_v50 = vrot.slane %v556_v42, 1  ;;  %v563_v28 = vrot.slane %v562_v55, 1  ;;  %v590_v40 = vmax.f32 %v1320_v2, %v589_v35 }
  0x73   :  { %v569_v31 = vrot.slane %v568_v11, 1  ;;  %v1379_v53 = vmax.f32 %v532_v19, %v533_v59  ;;  %v1381_v56 = vmax.f32 %v538_v44, %v539_v51  ;;  %v1383_v61 = vmax.f32 %v544_v43, %v545_v7 }
  0x74   :  { %v575_v0 = vrot.slane %v574_v18, 1  ;;  %v1385_v25 = vmax.f32 %v550_v37, %v551_v49  ;;  %v581_v33 = vrot.slane %v580_v23, 1  ;;  %v586_v8 = vmax.f32 %v584_v36, %v585_v22 }
  0x75   :  { %v591_v46 = vrot.slane %v590_v40, 2  ;;  %v1387_v47 = vmax.f32 %v556_v42, %v557_v50  ;;  %v1389_v63 = vmax.f32 %v562_v55, %v563_v28  ;;  %v1391_v45 = vmax.f32 %v568_v11, %v569_v31 }
  0x76   :  { %v595_v2 = vrot.slane %v1322_v21, 4  ;;  %v601_v59 = vrot.slane %v1324_v32, 4  ;;  %v607_v44 = vrot.slane %v1326_v16, 4  ;;  %v613_v43 = vrot.slane %v1328_v48, 4 }
  0x77   :  { %v592_v19 = vmax.f32 %v590_v40, %v591_v46  ;;  %v1397_v51 = vmax.f32 %v574_v18, %v575_v0  ;;  %v619_v9 = vrot.slane %v1334_v57, 4  ;;  %v625_v4 = vrot.slane %v1347_v34, 4 }
  0x78   :  { %v596_v17 = vmax.f32 %v1322_v21, %v595_v2  ;;  %v587_v15 = vrot.slane %v586_v8, 1  ;;  %v602_v62 = vmax.f32 %v1324_v32, %v601_v59  ;;  %v608_v7 = vmax.f32 %v1326_v16, %v607_v44 }
  0x79   :  { %v614_v6 = vmax.f32 %v1328_v48, %v613_v43  ;;  %v620_v20 = vmax.f32 %v1334_v57, %v619_v9  ;;  %v626_v37 = vmax.f32 %v1347_v34, %v625_v4  ;;  %v663_v27 = vcombine.low %v1167_v29, %v1171_v38 }
  0x7a   :  { %v597_v10 = vrot.slane %v596_v17, 2  ;;  %v593_v21 = vrot.slane %v592_v19, 1  ;;  %v603_v1 = vrot.slane %v602_v62, 2  ;;  %v609_v36 = vrot.slane %v608_v7, 2 }
  0x7b   :  { %v615_v42 = vrot.slane %v614_v6, 2  ;;  %v621_v11 = vrot.slane %v620_v20, 2  ;;  %v627_v35 = vrot.slane %v626_v37, 2  ;;  %v664_v32 = vcombine.low %v1200_v24, %v1206_v26 }
  0x7c   :  { %v598_v55 = vmax.f32 %v596_v17, %v597_v10  ;;  %v604_v16 = vmax.f32 %v602_v62, %v603_v1  ;;  %v610_v48 = vmax.f32 %v608_v7, %v609_v36  ;;  %v671_v57 = vrot.slane %v663_v27, %v1006_v52 }
  0x7d   :  { %v616_v49 = vmax.f32 %v614_v6, %v615_v42  ;;  %v622_v34 = vmax.f32 %v620_v20, %v621_v11  ;;  %v628_v22 = vmax.f32 %v626_v37, %v627_v35  ;;  %v678_v29 = vrot.slane %v664_v32, %v1006_v52 }
  0x7e   :  { %v599_v18 = vrot.slane %v598_v55, 1  ;;  %v582_v38 = vmax.f32 %v580_v23, %v581_v33  ;;  %v605_v50 = vrot.slane %v604_v16, 1  ;;  %v611_v28 = vrot.slane %v610_v48, 1 }
  0x7f   :  { %v617_v31 = vrot.slane %v616_v49, 1  ;;  %v588_v40 = vmax.f32 %v586_v8, %v587_v15  ;;  %v594_v0 = vmax.f32 %v592_v19, %v593_v21  ;;  %v623_v46 = vrot.slane %v622_v34, 1 }
  0x80   :  { %v629_v2 = vrot.slane %v628_v22, 1  ;;  %v600_v59 = vmax.f32 %v598_v55, %v599_v18  ;;  %v679_v24 = vcombine.low %v671_v57, %v678_v29  ;;  %v680_v26 = vcombine.low %v1234_v12, %v1238_v30 }
  0x81   :  { %v681_v44 = vcombine.low %v1282_v14, %v1296_v13  ;;  %v606_v43 = vmax.f32 %v604_v16, %v605_v50  ;;  %v612_v17 = vmax.f32 %v610_v48, %v611_v28  ;;  %v618_v9 = vmax.f32 %v616_v49, %v617_v31 }
  0x82   :  { %v697_v23 = vcombine.low %v1349_v58, %v1351_v5  ;;  %v624_v33 = vmax.f32 %v622_v34, %v623_v46  ;;  %v698_v8 = vcombine.low %v1353_v39, %v1355_v3  ;;  %v714_v19 = vcombine.low %v1357_v41, %v1359_v54 }
  0x83   :  { %v715_v12 = vcombine.low %v1365_v60, %v1379_v53  ;;  %v630_v30 = vmax.f32 %v628_v22, %v629_v2  ;;  %v731_v14 = vcombine.low %v1381_v56, %v1383_v61  ;;  %v732_v13 = vcombine.low %v1385_v25, %v1387_v47 }
  0x84   :  { %v748_v58 = vcombine.low %v1389_v63, %v1391_v45  ;;  %v688_v5 = vrot.slane %v680_v26, %v1006_v52  ;;  %v695_v39 = vrot.slane %v681_v44, %v1006_v52  ;;  %v705_v3 = vrot.slane %v697_v23, %v1006_v52 }
  0x85   :  { %v712_v41 = vrot.slane %v698_v8, %v1006_v52  ;;  %v739_v54 = vrot.slane %v731_v14, %v1006_v52  ;;  %v746_v60 = vrot.slane %v732_v13, %v1006_v52  ;;  %v749_v53 = vcombine.low %v1397_v51, %v582_v38 }
  0x86   :  { %v756_v56 = vrot.slane %v748_v58, %v1006_v52  ;;  %v722_v61 = vrot.slane %v714_v19, %v1006_v52  ;;  %v729_v25 = vrot.slane %v715_v12, %v1006_v52  ;;  %v765_v47 = vcombine.low %v588_v40, %v594_v0 }
  0x87   :  { %v766_v63 = vcombine.low %v600_v59, %v606_v43  ;;  %v747_v45 = vcombine.low %v739_v54, %v746_v60  ;;  %v763_v4 = vrot.slane %v749_v53, %v1006_v52  ;;  %v782_v15 = vcombine.low %v612_v17, %v618_v9 }
  0x88   :  { %v783_v62 = vcombine.low %v624_v33, %v630_v30  ;;  %v696_v7 = vcombine.low %v688_v5, %v695_v39  ;;  %v773_v6 = vrot.slane %v765_v47, %v1006_v52  ;;  %v713_v21 = vcombine.low %v705_v3, %v712_v41 }
  0x89   :  { %v780_v10 = vrot.slane %v766_v63, %v1006_v52  ;;  %v764_v51 = vcombine.low %v756_v56, %v763_v4  ;;  %v790_v20 = vrot.slane %v782_v15, %v1006_v52  ;;  %v803_v27 = vrot.slane %v747_v45, 7 }
  0x8a   :  { %v797_v37 = vrot.slane %v783_v62, %v1006_v52  ;;  %v730_v36 = vcombine.low %v722_v61, %v729_v25 }
  0x8b   :  { %v781_v1 = vcombine.low %v773_v6, %v780_v10  ;;  %v805_v55 = vsel %vm804_vm0, %v803_v27, %v679_v24  ;;  %v814_v11 = vrot.slane %v764_v51, 7 }
  0x8c   :  { %v798_v42 = vcombine.low %v790_v20, %v797_v37  ;;  %v807_v35 = vsel %vm806_vm1, %v803_v27, %v805_v55 }
  0x8d   :  { %v821_v32 = vrot.slane %v781_v1, 7  ;;  %v809_v16 = vsel %vm808_vm2, %v803_v27, %v807_v35  ;;  %v815_v48 = vsel %vm804_vm0, %v814_v11, %v696_v7 }
  0x8e   :  { %v828_v49 = vrot.slane %v798_v42, 7  ;;  %v811_v52 = vsel %vm810_vm3, %v803_v27, %v809_v16  ;;  %v816_v57 = vsel %vm806_vm1, %v814_v11, %v815_v48 }
  0x8f   :  { %v822_v18 = vsel %vm804_vm0, %v821_v32, %v713_v21  ;;  %v817_v34 = vsel %vm808_vm2, %v814_v11, %v816_v57  ;;  %837 = vst [vmem:[#allocation5] sm:$0xff] %v811_v52 }
  0x90   :  { %v823_v22 = vsel %vm806_vm1, %v821_v32, %v822_v18  ;;  %v829_v29 = vsel %vm804_vm0, %v828_v49, %v730_v36  ;;  %v818_v38 = vsel %vm810_vm3, %v814_v11, %v817_v34 }
  0x91   :  { %v824_v50 = vsel %vm808_vm2, %v821_v32, %v823_v22  ;;  %v830_v28 = vsel %vm806_vm1, %v828_v49, %v829_v29  ;;  %838 = vst [vmem:[#allocation5 + $0x8] sm:$0xff] %v818_v38 }
  0x92   :  { %v825_v31 = vsel %vm810_vm3, %v821_v32, %v824_v50  ;;  %v831_v40 = vsel %vm808_vm2, %v828_v49, %v830_v28 }
  0x93   :  { %v832_v0 = vsel %vm810_vm3, %v828_v49, %v831_v40  ;;  %839 = vst [vmem:[#allocation5 + $0x10] sm:$0xff] %v825_v31 }
  0x94   :  { %840 = vst [vmem:[#allocation5 + $0x18] sm:$0xff] %v832_v0 }
  0x95   :  { %894 = shalt.err (!%p891_p12)
}
  0x96   :  { %s895_s24 = scalar_lea.hbm %s1475_s1, 512 }
  0x97   :  { %p896_p13 = scmp.ne.s32.totalorder %s1475_s1, %s895_s24  ;;  %p899_p0 = scmp.lt.u32.totalorder %s895_s24, %s1475_s1 }
  0x99   :  { %p901_p1 = pnand %p899_p0, %p896_p13 }
  0x9b   :  { %904 = shalt.err (!%p901_p1)
}
  0x9c   :  { %850 = dma.vmem_to_hbm [thread:$0]  %s848_s20, 512, %s1475_s1, [#allocation4]  }
  0x9d   :  { %907 = dma.done.wait [#allocation4], 512  }
  0x9e   :  { %908 = vsyncadd [#allocation4], 4294966784 }
  0x9f   :  { %854 = vsyncpa [#allocation3], 1 }
  0xa0   :  { %855 = vsyncpa [#allocation4], 1 }

</bundles_post_ra>
